<compile_context>
chip_gen: v5e
topology: v5e:2x2
jax: 0.10.0
libtpu: 0.0.40
codegen_flags: <defaults>
</compile_context>

<pallas_src>
import jax
import jax.numpy as jnp
from jax.experimental import pallas as pl
from jax.experimental.pallas import tpu as pltpu


def _round_up(n, m):
    return ((n + m - 1) // m) * m


def _vmem_limit_bytes():
    """Scoped-VMEM limit to request (v5e/v6e: 128 MiB physical, v7x: 64 MiB)."""
    cap = None
    try:
        cap = getattr(pltpu.get_tpu_info(), "vmem_capacity_bytes", None)
    except Exception:
        cap = None
    if not cap:
        cap = 64 * 1024 * 1024          # conservative fallback (v7x physical)
    return min(int(cap) * 3 // 4, 100 * 1024 * 1024)


def _choose_tiling(batch, tile_cap):
    """Pick (tile_b, padded_b, n_steps).

    Prefers a tile that divides the batch exactly (no host-side pad copy of the
    activations) and >= 2 grid steps when there is enough work so both v7x
    TensorCores get a share of the "parallel" batch axis.
    """
    tile_cap = max(8, min(tile_cap, 4096))
    b8 = _round_up(batch, 8)
    min_steps = 2 if b8 >= 32 else 1
    if min_steps == 1 and b8 <= tile_cap:
        return batch, batch, 1                      # single full-extent block, no pad
    n = max(min_steps, pl.cdiv(b8, tile_cap))
    if batch % 8 == 0:
        for steps in range(n, min(n + 8, batch // 8 + 1)):
            if batch % steps == 0:
                t = batch // steps
                if t % 8 == 0 and t <= tile_cap:
                    return t, batch, steps          # exact split, no pad
    t = _round_up(pl.cdiv(b8, n), 8)
    return t, t * n, n                              # small pad (< 8*n_steps rows)


def classifier_kernel(x_ref, p_ref, w1x_ref, w1p_ref, b1_ref, alpha_ref,
                      w2_ref, b2_ref, out_ref):
    cdt = w1x_ref.dtype
    xv = x_ref[...].astype(cdt)
    # positions stream in their native int dtype; the cast is a free VPU op here.
    pv = p_ref[...].astype(jnp.float32).astype(cdt)
    # ---- pos_encoder Linear (concat folded into two dots) + bias ----
    h = (jnp.dot(xv, w1x_ref[...], preferred_element_type=jnp.float32)
         + jnp.dot(pv, w1p_ref[...], preferred_element_type=jnp.float32)
         + b1_ref[...])                                        # (tile_b, c_out_p) f32
    # ---- PReLU with a single shared scalar alpha (from SMEM), on f32 ----
    alpha = alpha_ref[0, 0]
    h = jnp.where(h >= 0.0, h, h * alpha)
    # ---- final Linear (eval-mode BatchNorm pre-folded into w2/b2) ----
    out_ref[...] = (jnp.dot(h.astype(cdt), w2_ref[...],
                            preferred_element_type=jnp.float32)
                    + b2_ref[...])


def classifier_forward(x, positions, params, *, compute_dtype=jnp.bfloat16):
    """x: (B, in_channels) f32, positions: (B, num_positions) int/float.

    Eval-mode forward of the Classifier module (num_positions > 0 path).
    """
    B, c_in = x.shape
    n_pos = positions.shape[1]
    c_out = params["w1"].shape[1]
    n_cls = params["w2"].shape[1]

    # --- fold eval-mode BatchNorm1d into the final Linear (trace time, free) --
    #   BN(h) = h*scale + shift;  BN(h) @ w2 + b2 = h @ (scale^T*w2) + (shift@w2 + b2)
    inv_std = jax.lax.rsqrt(params["var"] + 1e-5)        # (1, c_out)
    scale = params["gamma"] * inv_std                    # (1, c_out)
    shift = params["beta"] - params["mean"] * scale      # (1, c_out)
    w2_f = scale.reshape(-1, 1) * params["w2"]           # (c_out, n_cls)
    b2_f = params["b2"] + shift @ params["w2"]           # (1, n_cls)

    # --- zero-pad the hidden dim to a lane-dense multiple of 128 --------------
    c_out_p = _round_up(c_out, 128)
    w1 = params["w1"]
    b1 = params["b1"]
    if c_out_p != c_out:
        w1 = jnp.pad(w1, ((0, 0), (0, c_out_p - c_out)))
        b1 = jnp.pad(b1, ((0, 0), (0, c_out_p - c_out)))
        w2_f = jnp.pad(w2_f, ((0, c_out_p - c_out), (0, 0)))

    # --- optionally pad num_classes to 128 for lane-dense output stores -------
    # (only when the feature dim is big enough that the extra write traffic is noise)
    n_cls_p = _round_up(n_cls, 128) if (c_in + n_pos) >= 256 else n_cls
    if n_cls_p != n_cls:
        w2_f = jnp.pad(w2_f, ((0, 0), (0, n_cls_p - n_cls)))
        b2_f = jnp.pad(b2_f, ((0, 0), (0, n_cls_p - n_cls)))

    # --- bf16 weights (MXU-native on all generations), f32 biases -------------
    w1_x = w1[:c_in].astype(compute_dtype)               # (c_in, c_out_p)
    w1_p = w1[c_in:].astype(compute_dtype)               # (n_pos, c_out_p)
    w2_c = w2_f.astype(compute_dtype)                    # (c_out_p, n_cls_p)
    b1 = b1.astype(jnp.float32)
    b2_f = b2_f.astype(jnp.float32)
    alpha = params["alpha"].astype(jnp.float32)

    # --- batch tiling from the per-generation VMEM budget ---------------------
    vmem_limit = _vmem_limit_bytes()
    weight_bytes = 2 * sum(int(a.size) * a.dtype.itemsize
                           for a in (w1_x, w1_p, w2_c, b1, b2_f))
    act_row_bytes = 2 * (x.dtype.itemsize * c_in
                         + positions.dtype.itemsize * n_pos
                         + 4 * n_cls_p)                  # double-buffered in/out
    budget = int(vmem_limit * 0.8) - weight_bytes
    tile_cap = max(8, (budget // act_row_bytes // 8) * 8)
    tile_b, padded_b, n_steps = _choose_tiling(B, tile_cap)

    if padded_b != B:   # only for ragged batches; pads < 8 rows per grid step
        x = jnp.pad(x, ((0, padded_b - B), (0, 0)))
        positions = jnp.pad(positions, ((0, padded_b - B), (0, 0)))

    const = lambda i: (0, 0)   # weights / biases stay resident across batch tiles
    batch = lambda i: (i, 0)

    flops = 2 * padded_b * ((c_in + n_pos) * c_out_p + c_out_p * n_cls_p)
    bytes_accessed = (padded_b * (x.dtype.itemsize * c_in
                                  + positions.dtype.itemsize * n_pos
                                  + 4 * n_cls_p)
                      + weight_bytes // 2 + 4)

    out = pl.pallas_call(
        classifier_kernel,
        out_shape=jax.ShapeDtypeStruct((padded_b, n_cls_p), jnp.float32),
        grid=(n_steps,),
        in_specs=[
            pl.BlockSpec((tile_b, c_in), batch),                    # x tile
            pl.BlockSpec((tile_b, n_pos), batch),                   # positions tile
            pl.BlockSpec((c_in, c_out_p), const),                   # w1_x (resident)
            pl.BlockSpec((n_pos, c_out_p), const),                  # w1_p (resident)
            pl.BlockSpec((1, c_out_p), const),                      # b1
            pl.BlockSpec((1, 1), const,
                         memory_space=pltpu.MemorySpace.SMEM),      # PReLU alpha
            pl.BlockSpec((c_out_p, n_cls_p), const),                # w2 (BN folded)
            pl.BlockSpec((1, n_cls_p), const),                      # b2 (BN folded)
        ],
        out_specs=pl.BlockSpec((tile_b, n_cls_p), batch),
        compiler_params=pltpu.CompilerParams(
            dimension_semantics=("parallel",),
            vmem_limit_bytes=vmem_limit),
        cost_estimate=pl.CostEstimate(
            flops=flops, transcendentals=0, bytes_accessed=bytes_accessed),
    )(x, positions, w1_x, w1_p, b1, alpha, w2_c, b2_f)

    if padded_b != B:
        out = out[:B]
    if n_cls_p != n_cls:
        out = out[:, :n_cls]
    return out


def make_params(key, in_channels, out_channels, num_pred_classes, num_positions):
    k = jax.random.split(key, 8)
    d_in = in_channels + num_positions
    return {
        # pos_encoder Linear (stored as (in, out); equivalent to torch's x @ W.T)
        "w1": jax.random.normal(k[0], (d_in, out_channels), jnp.float32) * 0.1,
        "b1": jax.random.normal(k[1], (1, out_channels), jnp.float32) * 0.1,
        # PReLU single parameter, torch default init 0.25
        "alpha": jnp.full((1, 1), 0.25, jnp.float32),
        # BatchNorm1d affine + running stats (deterministic, non-trivial values)
        "gamma": 1.0 + 0.1 * jax.random.normal(k[2], (1, out_channels), jnp.float32),
        "beta": 0.1 * jax.random.normal(k[3], (1, out_channels), jnp.float32),
        "mean": 0.1 * jax.random.normal(k[4], (1, out_channels), jnp.float32),
        "var": jnp.abs(1.0 + 0.1 * jax.random.normal(k[5], (1, out_channels), jnp.float32)),
        # final Linear
        "w2": jax.random.normal(k[6], (out_channels, num_pred_classes), jnp.float32) * 0.1,
        "b2": jax.random.normal(k[7], (1, num_pred_classes), jnp.float32) * 0.1,
    }


def reference_forward(x, positions, p):
    """Pure-JAX f32 reference of the same eval-mode forward (un-fused math)."""
    xp = jnp.concatenate([x, positions.astype(jnp.float32)], axis=1)
    h = xp @ p["w1"] + p["b1"]
    h = jnp.where(h >= 0.0, h, h * p["alpha"])
    h = (h - p["mean"]) / jnp.sqrt(p["var"] + 1e-5) * p["gamma"] + p["beta"]
    return h @ p["w2"] + p["b2"]


if __name__ == "__main__":
    B, in_channels, out_channels = 8, 16, 32
    num_pred_classes, num_positions = 10, 4

    key = jax.random.PRNGKey(0)
    kx, kp, kw = jax.random.split(key, 3)

    x = jax.random.normal(kx, (B, in_channels), jnp.float32)
    positions = jax.random.randint(kp, (B, num_positions), 0, 2).astype(jnp.int32)

    params = make_params(kw, in_channels, out_channels, num_pred_classes, num_positions)

    out = classifier_forward(x, positions, params)
    out = jax.block_until_ready(out)

    ref = reference_forward(x, positions, params)
    assert out.shape == (B, num_pred_classes)
    # bf16 weight streaming (f32 accumulation) -> slightly looser tolerance vs f32 ref.
    assert jnp.allclose(out, ref, atol=2e-2, rtol=2e-2)

    print("KERNEL_OK")
</pallas_src>

<mosaic_0001>
module attributes {stable_mosaic.version = 11 : i64} {
  func.func @classifier_kernel(%arg0: i32, %arg1: memref<8x16xf32, #tpu.memory_space<vmem>>, %arg2: memref<8x4xi32, #tpu.memory_space<vmem>>, %arg3: memref<16x128xbf16, #tpu.memory_space<vmem>>, %arg4: memref<4x128xbf16, #tpu.memory_space<vmem>>, %arg5: memref<1x128xf32, #tpu.memory_space<vmem>>, %arg6: memref<1x1xf32, #tpu.memory_space<smem>>, %arg7: memref<128x10xbf16, #tpu.memory_space<vmem>>, %arg8: memref<1x10xf32, #tpu.memory_space<vmem>>, %arg9: memref<8x10xf32, #tpu.memory_space<vmem>>) attributes {dimension_semantics = [#tpu.dimension_semantics<parallel>], iteration_bounds = array<i64: 1>, scalar_prefetch = 0 : i64, scratch_operands = 0 : i64, tpu.core_type = #tpu.core_type<tc>, window_params = [{transform_indices = @transform_0, window_bounds = array<i64: 8, 16>}, {transform_indices = @transform_1, window_bounds = array<i64: 8, 4>}, {pipeline_mode = #tpu.pipeline_mode<synchronous>, transform_indices = @transform_2, window_bounds = array<i64: 16, 128>}, {pipeline_mode = #tpu.pipeline_mode<synchronous>, transform_indices = @transform_3, window_bounds = array<i64: 4, 128>}, {pipeline_mode = #tpu.pipeline_mode<synchronous>, transform_indices = @transform_4, window_bounds = array<i64: 1, 128>}, {transform_indices = @transform_5, window_bounds = array<i64: 1, 1>}, {pipeline_mode = #tpu.pipeline_mode<synchronous>, transform_indices = @transform_6, window_bounds = array<i64: 128, 10>}, {pipeline_mode = #tpu.pipeline_mode<synchronous>, transform_indices = @transform_7, window_bounds = array<i64: 1, 10>}, {transform_indices = @transform_8, window_bounds = array<i64: 8, 10>}]} {
    %c0 = arith.constant 0 : index
    %c0_0 = arith.constant 0 : index
    %0 = vector.load %arg1[%c0, %c0_0] : memref<8x16xf32, #tpu.memory_space<vmem>>, vector<8x16xf32>
    %1 = arith.truncf %0 : vector<8x16xf32> to vector<8x16xbf16>
    %c0_1 = arith.constant 0 : index
    %c0_2 = arith.constant 0 : index
    %2 = vector.load %arg2[%c0_1, %c0_2] : memref<8x4xi32, #tpu.memory_space<vmem>>, vector<8x4xi32>
    %3 = arith.sitofp %2 : vector<8x4xi32> to vector<8x4xf32>
    %4 = arith.truncf %3 : vector<8x4xf32> to vector<8x4xbf16>
    %c0_3 = arith.constant 0 : index
    %c0_4 = arith.constant 0 : index
    %5 = vector.load %arg3[%c0_3, %c0_4] : memref<16x128xbf16, #tpu.memory_space<vmem>>, vector<16x128xbf16>
    %cst = arith.constant dense<0.000000e+00> : vector<8x128xf32>
    %6 = tpu.matmul %1, %5, %cst {dimension_numbers = #tpu.dot_dimension_numbers<[1], [0], [0], [1], [0, 0, 1, 1], [], []>} : vector<8x16xbf16>, vector<16x128xbf16>, vector<8x128xf32> -> vector<8x128xf32>
    %c0_5 = arith.constant 0 : index
    %c0_6 = arith.constant 0 : index
    %7 = vector.load %arg4[%c0_5, %c0_6] : memref<4x128xbf16, #tpu.memory_space<vmem>>, vector<4x128xbf16>
    %cst_7 = arith.constant dense<0.000000e+00> : vector<8x128xf32>
    %8 = tpu.matmul %4, %7, %cst_7 {dimension_numbers = #tpu.dot_dimension_numbers<[1], [0], [0], [1], [0, 0, 1, 1], [], []>} : vector<8x4xbf16>, vector<4x128xbf16>, vector<8x128xf32> -> vector<8x128xf32>
    %9 = arith.addf %6, %8 : vector<8x128xf32>
    %c0_8 = arith.constant 0 : index
    %c0_9 = arith.constant 0 : index
    %10 = vector.load %arg5[%c0_8, %c0_9] : memref<1x128xf32, #tpu.memory_space<vmem>>, vector<1x128xf32>
    %11 = vector.broadcast %10 : vector<1x128xf32> to vector<8x128xf32>
    %12 = arith.addf %9, %11 : vector<8x128xf32>
    %c0_10 = arith.constant 0 : index
    %c0_11 = arith.constant 0 : index
    %13 = memref.load %arg6[%c0_10, %c0_11] : memref<1x1xf32, #tpu.memory_space<smem>>
    %cst_12 = arith.constant 0.000000e+00 : f32
    %14 = vector.broadcast %cst_12 : f32 to vector<8x128xf32>
    %15 = arith.cmpf oge, %12, %14 : vector<8x128xf32>
    %16 = vector.broadcast %13 : f32 to vector<8x128xf32>
    %17 = arith.mulf %12, %16 : vector<8x128xf32>
    %18 = arith.select %15, %12, %17 : vector<8x128xi1>, vector<8x128xf32>
    %19 = arith.truncf %18 : vector<8x128xf32> to vector<8x128xbf16>
    %c0_13 = arith.constant 0 : index
    %c0_14 = arith.constant 0 : index
    %20 = vector.load %arg7[%c0_13, %c0_14] : memref<128x10xbf16, #tpu.memory_space<vmem>>, vector<128x10xbf16>
    %cst_15 = arith.constant dense<0.000000e+00> : vector<8x10xf32>
    %21 = tpu.matmul %19, %20, %cst_15 {dimension_numbers = #tpu.dot_dimension_numbers<[1], [0], [0], [1], [0, 0, 1, 1], [], []>} : vector<8x128xbf16>, vector<128x10xbf16>, vector<8x10xf32> -> vector<8x10xf32>
    %c0_16 = arith.constant 0 : index
    %c0_17 = arith.constant 0 : index
    %22 = vector.load %arg8[%c0_16, %c0_17] : memref<1x10xf32, #tpu.memory_space<vmem>>, vector<1x10xf32>
    %23 = vector.broadcast %22 : vector<1x10xf32> to vector<8x10xf32>
    %24 = arith.addf %21, %23 : vector<8x10xf32>
    %c0_18 = arith.constant 0 : index
    %c0_19 = arith.constant 0 : index
    %25 = vector.load %arg9[%c0_18, %c0_19] : memref<8x10xf32, #tpu.memory_space<vmem>>, vector<8x10xf32>
    tpu.vector_store %arg9[%c0_18, %c0_19], %24 {strides = array<i32>} : memref<8x10xf32, #tpu.memory_space<vmem>>, vector<8x10xf32>,
    return
  }
  func.func @transform_0(%arg0: i32) -> (i32, i32) {
    %c0_i32 = arith.constant 0 : i32
    %c0_i32_0 = arith.constant 0 : i32
    return %arg0, %c0_i32 : i32, i32
  }
  func.func @transform_1(%arg0: i32) -> (i32, i32) {
    %c0_i32 = arith.constant 0 : i32
    %c0_i32_0 = arith.constant 0 : i32
    return %arg0, %c0_i32 : i32, i32
  }
  func.func @transform_2(%arg0: i32) -> (i32, i32) {
    %c0_i32 = arith.constant 0 : i32
    %c0_i32_0 = arith.constant 0 : i32
    %c0_i32_1 = arith.constant 0 : i32
    return %c0_i32, %c0_i32_0 : i32, i32
  }
  func.func @transform_3(%arg0: i32) -> (i32, i32) {
    %c0_i32 = arith.constant 0 : i32
    %c0_i32_0 = arith.constant 0 : i32
    %c0_i32_1 = arith.constant 0 : i32
    return %c0_i32, %c0_i32_0 : i32, i32
  }
  func.func @transform_4(%arg0: i32) -> (i32, i32) {
    %c0_i32 = arith.constant 0 : i32
    %c0_i32_0 = arith.constant 0 : i32
    %c0_i32_1 = arith.constant 0 : i32
    return %c0_i32, %c0_i32_0 : i32, i32
  }
  func.func @transform_5(%arg0: i32) -> (i32, i32) {
    %c0_i32 = arith.constant 0 : i32
    %c0_i32_0 = arith.constant 0 : i32
    %c0_i32_1 = arith.constant 0 : i32
    return %c0_i32, %c0_i32_0 : i32, i32
  }
  func.func @transform_6(%arg0: i32) -> (i32, i32) {
    %c0_i32 = arith.constant 0 : i32
    %c0_i32_0 = arith.constant 0 : i32
    %c0_i32_1 = arith.constant 0 : i32
    return %c0_i32, %c0_i32_0 : i32, i32
  }
  func.func @transform_7(%arg0: i32) -> (i32, i32) {
    %c0_i32 = arith.constant 0 : i32
    %c0_i32_0 = arith.constant 0 : i32
    %c0_i32_1 = arith.constant 0 : i32
    return %c0_i32, %c0_i32_0 : i32, i32
  }
  func.func @transform_8(%arg0: i32) -> (i32, i32) {
    %c0_i32 = arith.constant 0 : i32
    %c0_i32_0 = arith.constant 0 : i32
    return %arg0, %c0_i32 : i32, i32
  }
}

</mosaic_0001>

<bundles_post_ra>
// kernel: tpu_custom_call.1
= control target key start
LH: loop header
LB: loop body
LE: loop exit
PB: predicated region body
PF: predicated region fallthrough
CT: control target
= control target key end

     0   :  { %vm44_vm0 = vcmask 1041408   ;;  %vm40_vm1 = vcmask 31744   ;;  %vm67_vm2 = vcmask 130048   ;;  %s364_s0 = inlined_call_operand.vmem [shape: f32[8,16], index: 0, kind: input, shape index: {}]   ;;  %s365_s1 = inlined_call_operand.vmem [shape: s32[8,4], index: 1, kind: input, shape index: {}]   ;;  %s366_s2 = inlined_call_operand.vmem [shape: bf16[16,128], index: 2, kind: input, shape index: {}]   ;;  %s367_s3 = inlined_call_operand.vmem [shape: bf16[4,128], index: 3, kind: input, shape index: {}]   ;;  %s368_s4 = inlined_call_operand.vmem [shape: f32[1,128], index: 4, kind: input, shape index: {}]   ;;  %s369_s5 = inlined_call_operand.<no memory space> [shape: f32[1,1], index: 5, kind: input, shape index: {}]   ;;  %s370_s6 = inlined_call_operand.vmem [shape: bf16[128,10], index: 6, kind: input, shape index: {}]   ;;  %s371_s7 = inlined_call_operand.vmem [shape: f32[1,10], index: 7, kind: input, shape index: {}]   ;;  %s372_s8 = inlined_call_operand.hbm [shape: f32[8,10], index: 8, kind: output, shape index: {}]  }
   0x1   :  { %v39_v0 = vld [vmem:[%s367_s3] sm:$0x3]  ;;  %v240_v6 = vld [vmem:[%s370_s6 + $0x38] sm:$0xff]  ;;  %v239_v8 = vld [vmem:[%s370_s6 + $0x30] sm:$0xff] }
   0x2   :  { %v232_v1 = vld [vmem:[%s366_s2] sm:$0xff]  ;;  %v46_v3 = vsel %vm44_vm0, %v39_v0, 0  ;;  %163 = vmatpush.bf16.msra.mxu2 %v240_v6 }
   0x3   :  { %v34_v2 = vld [vmem:[%s365_s1] sm:$0xff]  ;;  %55 = vmatpush.bf16.msra.mxu0 %v46_v3  ;;  %78 = vmatpush.bf16.msra.mxu1 %v232_v1 }
   0x4   :  { %v35_v4 = vcvt.s32.f32 %v34_v2  ;;  %v32_v5 = vld [vmem:[%s364_s0] sm:$0xff] }
   0x5   :  { %v33_v7 = vpack.c.bf16 %v32_v5, %v32_v5 }
   0x6   :  { %v36_v9 = vpack.c.bf16 %v35_v4, %v35_v4 }
   0x7   :  { %14 = vsyncpa [#allocation4], 0  ;;  %199 = vmatmul.msk.bf16.vlgmr.msra.gmra.mxu1 %vm67_vm2, %v33_v7  ;;  %164 = vmatpush.bf16.msra.mxu2 %v239_v8  ;;  %v238_v10 = vld [vmem:[%s370_s6 + $0x28] sm:$0xff]  ;;  %v237_v11 = vld [vmem:[%s370_s6 + $0x20] sm:$0xff]  ;;  %v91_v20 = vstv %s369_s5  ;;  %s185_s11 = sshll.u32 %s372_s8, 4  ;;  %vm176_vm4 = vcmask 80896   ;;  %s186_s11 = int_to_ptr.hbm [resolvable:$true] %s185_s11 }
   0x8   :  { %194 = vmatmul.msk.bf16.vlgmr.msra.gmra.mxu0 %vm40_vm1, %v36_v9  ;;  %v236_v12 = vld [vmem:[%s370_s6 + $0x18] sm:$0xff]  ;;  %v235_v13 = vld [vmem:[%s370_s6 + $0x10] sm:$0xff]  ;;  %v234_v14 = vld [vmem:[%s370_s6 + $0x8] sm:$0xff] }
   0x9   :  { %v233_v15 = vld [vmem:[%s370_s6] sm:$0xff] }
   0xa   :  { %v242_v16 = vld [vmem:[%s368_s4] ss:$0 sm:$0xff]  ;;  %s270_s4 = smov [#allocation3]  }
   0xb   :  { %165 = vmatpush.bf16.msra.mxu2 %v238_v10  ;;  %v243_v27 = vld [vmem:[%s371_s7] ss:$0 sm:$0xff]  ;;  %s183_s30 = sshll.u32 %s270_s4, 4  ;;  %s184_s30 = int_to_ptr.vmem [resolvable:$true] %s183_s30 }
   0xf   :  { %166 = vmatpush.bf16.msra.mxu2 %v237_v11 }
  0x13   :  { %167 = vmatpush.bf16.msra.mxu2 %v236_v12 }
  0x17   :  { %168 = vmatpush.bf16.msra.mxu2 %v235_v13 }
  0x1b   :  { %169 = vmatpush.bf16.msra.mxu2 %v234_v14 }
  0x1f   :  { %170 = vmatpush.bf16.msra.mxu2 %v233_v15 }
  0x84   :  { %v80_v18 = vpop.f32.mrf.mxu1 }
  0x85   :  { %v57_v17 = vpop.f32.mrf.mxu0 }
  0x86   :  { %v81_v19 = vadd.f32 %v80_v18, %v57_v17 }
  0x88   :  { %v88_v21 = vadd.f32 %v242_v16, %v81_v19 }
  0x8a   :  { %vm90_vm3 = vcmp.ge.f32.partialorder %v88_v21, 0.0  ;;  %v92_v22 = vmul.f32 %v91_v20, %v88_v21 }
  0x8c   :  { %v93_v23 = vsel %vm90_vm3, %v88_v21, %v92_v22  ;;  %v82_v25 = vpop.f32.mrf.mxu1 }
  0x8d   :  { %v59_v24 = vpop.f32.mrf.mxu0  ;;  %v94_v26 = vpack.c.bf16 %v93_v23, %v93_v23 }
  0x8f   :  { %171 = vmatmul.bf16.vlgmr.msra.gmra.mxu2 %v94_v26 }
 0x112   :  { %v172_v28 = vpop.f32.mrf.mxu2 }
 0x113   :  { %v173_v29 = vadd.f32 %v243_v27, %v172_v28 }
 0x115   :  { %177 = vst.msk [vmem:[#allocation3] sm:$0xff] %vm176_vm4, %v173_v29 }
 0x116   :  { %188 = dma.vmem_to_hbm [thread:$0]  %s184_s30, 128, %s186_s11, [#allocation4]  }
 0x11a   :  { %v174_v30 = vpop.f32.mrf.mxu2 }
 0x11b   :  { %268 = dma.done.wait [#allocation4], 128  }
 0x11c   :  { %269 = vsyncadd [#allocation4], 4294967168 }
 0x11d   :  { %193 = vsyncpa [#allocation4], 1 }

</bundles_post_ra>
